<compile_context>
chip_gen: v5e
topology: v5e:2x2
jax: 0.10.0
libtpu: 0.0.40
codegen_flags: <defaults>
</compile_context>

<pallas_src>
import jax
import jax.numpy as jnp
from jax.experimental import pallas as pl
from jax.experimental.pallas import tpu as pltpu

_MIB = 1024 * 1024


def _cdiv(a: int, b: int) -> int:
    return (a + b - 1) // b


def _round_up(x: int, m: int) -> int:
    return _cdiv(x, m) * m


def _maybe_int(v):
    try:
        v = int(v)
        return v if v > 0 else None
    except Exception:
        return None


def _tpu_budgets():
    """Generation-aware (block_bytes, vmem_limit_bytes, num_tensorcores)."""
    vmem_cap = None
    num_tc = None
    try:
        info = pltpu.get_tpu_info()
        vmem_cap = _maybe_int(getattr(info, "vmem_capacity_bytes", None))
        for name in ("num_tensorcores", "tensorcore_count", "num_cores", "core_count"):
            num_tc = _maybe_int(getattr(info, name, None))
            if num_tc is not None:
                break
    except Exception:  # query unavailable (interpret mode, older runtime, ...)
        pass

    if vmem_cap is not None and vmem_cap >= 96 * _MIB:
        # v5e / v6e: 128 MiB physical VMEM, one TensorCore per chip.
        block_bytes, vmem_limit = 8 * _MIB, 64 * _MIB
        if num_tc is None:
            num_tc = 1
    else:
        # v7x (64 MiB VMEM per TC, 2 TCs) or unknown: conservative VMEM use,
        # but guarantee >= 2 parallel row blocks so both cores can stream.
        block_bytes, vmem_limit = 6 * _MIB, 40 * _MIB
        if num_tc is None:
            num_tc = 2
    return block_bytes, vmem_limit, max(1, num_tc)


def _divisor_hw_tile(hw: int, max_tile: int):
    """Largest multiple of 128 that divides hw and is <= max_tile (or None)."""
    if hw % 128 != 0:
        return None
    n = hw // 128
    for d in range(min(n, max_tile // 128), 0, -1):
        if n % d == 0:
            return 128 * d
    return None


def _make_single_step_kernel(inv_hw: float):
    """Full H*W in one lane block: load once, reduce, write. No scratch."""

    def kernel(x_ref, o_ref):
        xt = x_ref[...]                                   # native dtype tile
        s = jnp.sum(xt.astype(jnp.float32), axis=-1, keepdims=True)
        m = jnp.max(xt, axis=-1, keepdims=True).astype(jnp.float32)
        o_ref[...] = (0.5 * (s * inv_hw) + 0.5 * m).astype(o_ref.dtype)

    return kernel


def _make_accum_kernel(hw: int, hw_tile: int, needs_mask: bool, inv_hw: float):
    """Huge H*W: accumulate sum/max over lane tiles; mask only the edge tile."""

    def kernel(x_ref, o_ref, sum_acc, max_acc):
        k = pl.program_id(1)
        last = pl.num_programs(1) - 1

        @pl.when(k == 0)
        def _():
            sum_acc[...] = jnp.zeros_like(sum_acc)
            max_acc[...] = jnp.full_like(max_acc, -jnp.inf)

        def accumulate(masked):
            xt = x_ref[...]                               # native dtype tile
            xf = xt.astype(jnp.float32)
            if masked:
                lane = jax.lax.broadcasted_iota(jnp.int32, xt.shape, 1)
                valid = (k * hw_tile + lane) < hw
                fill = jnp.asarray(jnp.finfo(xt.dtype).min, dtype=xt.dtype)
                xs = jnp.where(valid, xf, 0.0)
                xm = jnp.where(valid, xt, fill)
            else:
                xs = xf
                xm = xt
            sum_acc[...] += jnp.sum(xs, axis=-1, keepdims=True)
            tmax = jnp.max(xm, axis=-1, keepdims=True).astype(jnp.float32)
            max_acc[...] = jnp.maximum(max_acc[...], tmax)

        if needs_mask:
            # Only the final lane tile pays for the iota/where masking.
            @pl.when(k != last)
            def _():
                accumulate(False)

            @pl.when(k == last)
            def _():
                accumulate(True)
        else:
            accumulate(False)

        @pl.when(k == last)
        def _():
            res = 0.5 * (sum_acc[...] * inv_hw) + 0.5 * max_acc[...]
            o_ref[...] = res.astype(o_ref.dtype)

    return kernel


def fast_adaptive_avg_max_pool(x, flatten: bool = False, input_fmt: str = "NCHW",
                               *, block_bytes: int | None = None):
    """0.5 * adaptive_avg_pool(x, 1) + 0.5 * adaptive_max_pool(x, 1) for NCHW."""
    # TODO(synk): only the default NCHW input_fmt is implemented.
    assert input_fmt == "NCHW", "only NCHW input_fmt is supported"
    assert x.ndim == 4, "expected NCHW input"
    assert jnp.issubdtype(x.dtype, jnp.floating), "floating dtypes only"

    B, C, H, W = x.shape
    bc, hw = B * C, H * W
    xr = x.reshape(bc, hw)  # free view: rows on sublanes, H*W lane-dense

    itemsize = jnp.dtype(x.dtype).itemsize
    sub = max(8, 32 // itemsize)     # sublane packing: 8 f32 / 16 bf16 / 32 int8
    auto_block, vmem_limit, num_tc = _tpu_budgets()
    if block_bytes is None:
        block_bytes = auto_block

    hw_pad = _round_up(hw, 128)      # lane-padded width as held in VMEM
    min_rows = bc if bc < sub else sub
    inv_hw = 1.0 / float(hw)

    if hw_pad * itemsize * min_rows <= block_bytes:
        # ---- Case A: full spatial extent fits in one lane block. ----------
        # Budget per row includes the (R, 1) output block's 128-lane padding.
        row_budget = max(1, block_bytes // ((hw_pad + 128) * itemsize))
        if bc <= row_budget and (num_tc <= 1 or bc <= sub):
            row_tile = bc                      # single full-extent block
        else:
            row_tile = max(sub, (row_budget // sub) * sub)
            if num_tc > 1:
                # >= num_tc row blocks so every TensorCore gets work.
                row_tile = min(row_tile, _round_up(_cdiv(bc, num_tc), sub))
            if row_tile >= bc:
                row_tile = bc
        grid = (_cdiv(bc, row_tile),)
        out = pl.pallas_call(
            _make_single_step_kernel(inv_hw),
            out_shape=jax.ShapeDtypeStruct((bc, 1), x.dtype),
            grid=grid,
            in_specs=[pl.BlockSpec((row_tile, hw), lambda i: (i, 0))],
            out_specs=pl.BlockSpec((row_tile, 1), lambda i: (i, 0)),
            compiler_params=pltpu.CompilerParams(
                dimension_semantics=("parallel",),
                vmem_limit_bytes=vmem_limit,
            ),
        )(xr)
    else:
        # ---- Case B: very large H*W -> pipeline lane tiles, accumulate. ----
        row_tile = bc if bc < sub else sub
        rows_pad = _round_up(row_tile, sub)
        lane_budget = max(128, ((block_bytes // (rows_pad * itemsize)) // 128) * 128)
        hw_tile = _divisor_hw_tile(hw, lane_budget)
        if hw_tile is not None and hw_tile >= lane_budget // 2:
            needs_mask = False                 # tile divides H*W exactly
        else:
            hw_tile = lane_budget
            needs_mask = (hw % hw_tile) != 0   # masked on the last tile only
        grid = (_cdiv(bc, row_tile), _cdiv(hw, hw_tile))
        out = pl.pallas_call(
            _make_accum_kernel(hw, hw_tile, needs_mask, inv_hw),
            out_shape=jax.ShapeDtypeStruct((bc, 1), x.dtype),
            grid=grid,
            in_specs=[pl.BlockSpec((row_tile, hw_tile), lambda i, k: (i, k))],
            out_specs=pl.BlockSpec((row_tile, 1), lambda i, k: (i, 0)),
            scratch_shapes=[
                pltpu.VMEM((row_tile, 1), jnp.float32),   # running sum
                pltpu.VMEM((row_tile, 1), jnp.float32),   # running max
            ],
            compiler_params=pltpu.CompilerParams(
                dimension_semantics=("parallel", "arbitrary"),
                vmem_limit_bytes=vmem_limit,
            ),
        )(xr)

    out = out.reshape(B, C)
    if not flatten:
        out = out.reshape(B, C, 1, 1)
    return out


def _reference(x, flatten: bool = False):
    keep = not flatten
    return 0.5 * jnp.mean(x, axis=(2, 3), keepdims=keep) + 0.5 * jnp.max(
        x, axis=(2, 3), keepdims=keep
    )


if __name__ == "__main__":
    key = jax.random.PRNGKey(0)
    B, C, H, W = 2, 4, 16, 16
    x = jax.random.normal(key, (B, C, H, W), dtype=jnp.float32)

    # flatten=False (default): output (B, C, 1, 1)
    y0 = jax.block_until_ready(fast_adaptive_avg_max_pool(x, flatten=False))
    r0 = _reference(x, flatten=False)
    assert y0.shape == r0.shape, (y0.shape, r0.shape)
    assert jnp.allclose(y0, r0, atol=1e-5, rtol=1e-5)

    # flatten=True: output (B, C)
    y1 = jax.block_until_ready(fast_adaptive_avg_max_pool(x, flatten=True))
    r1 = _reference(x, flatten=True)
    assert y1.shape == r1.shape, (y1.shape, r1.shape)
    assert jnp.allclose(y1, r1, atol=1e-5, rtol=1e-5)

    # bf16 input: kernel accumulates in f32, casts the result back to bf16.
    xb = x.astype(jnp.bfloat16)
    y2 = jax.block_until_ready(fast_adaptive_avg_max_pool(xb, flatten=False))
    r2 = _reference(xb.astype(jnp.float32), flatten=False)
    assert y2.shape == r2.shape, (y2.shape, r2.shape)
    assert jnp.allclose(y2.astype(jnp.float32), r2, atol=2e-2, rtol=2e-2)

    # Exercise the accumulating (tiled H*W) path incl. edge masking by forcing
    # a tiny per-block byte budget on a spatial extent not 128-aligned.
    xs = jax.random.normal(jax.random.PRNGKey(1), (2, 3, 45, 45), dtype=jnp.float32)
    y3 = jax.block_until_ready(
        fast_adaptive_avg_max_pool(xs, flatten=False, block_bytes=32 * 1024))
    r3 = _reference(xs, flatten=False)
    assert y3.shape == r3.shape, (y3.shape, r3.shape)
    assert jnp.allclose(y3, r3, atol=1e-5, rtol=1e-5)

    print("KERNEL_OK")
</pallas_src>

<mosaic_0001>
module attributes {stable_mosaic.version = 11 : i64} {
  func.func @kernel(%arg0: i32, %arg1: memref<8x256xf32, #tpu.memory_space<vmem>>, %arg2: memref<8x1xf32, #tpu.memory_space<vmem>>) attributes {dimension_semantics = [#tpu.dimension_semantics<parallel>], iteration_bounds = array<i64: 1>, scalar_prefetch = 0 : i64, scratch_operands = 0 : i64, tpu.core_type = #tpu.core_type<tc>, window_params = [{transform_indices = @transform_0, window_bounds = array<i64: 8, 256>}, {transform_indices = @transform_1, window_bounds = array<i64: 8, 1>}]} {
    %c0 = arith.constant 0 : index
    %c0_0 = arith.constant 0 : index
    %0 = vector.load %arg1[%c0, %c0_0] : memref<8x256xf32, #tpu.memory_space<vmem>>, vector<8x256xf32>
    %cst = arith.constant dense<0.000000e+00> : vector<8xf32>
    %1 = vector.multi_reduction <add>, %0, %cst [1] : vector<8x256xf32> to vector<8xf32>
    %2 = vector.shape_cast %1 : vector<8xf32> to vector<8x1xf32>
    %cst_1 = arith.constant dense<0xFF800000> : vector<8xf32>
    %3 = vector.multi_reduction <maximumf>, %0, %cst_1 [1] : vector<8x256xf32> to vector<8xf32>
    %4 = vector.shape_cast %3 : vector<8xf32> to vector<8x1xf32>
    %cst_2 = arith.constant 3.906250e-03 : f32
    %5 = vector.broadcast %cst_2 : f32 to vector<8x1xf32>
    %6 = arith.mulf %2, %5 : vector<8x1xf32>
    %cst_3 = arith.constant 5.000000e-01 : f32
    %7 = vector.broadcast %cst_3 : f32 to vector<8x1xf32>
    %8 = arith.mulf %7, %6 : vector<8x1xf32>
    %cst_4 = arith.constant 5.000000e-01 : f32
    %9 = vector.broadcast %cst_4 : f32 to vector<8x1xf32>
    %10 = arith.mulf %9, %4 : vector<8x1xf32>
    %11 = arith.addf %8, %10 : vector<8x1xf32>
    %c0_5 = arith.constant 0 : index
    %c0_6 = arith.constant 0 : index
    %12 = vector.load %arg2[%c0_5, %c0_6] : memref<8x1xf32, #tpu.memory_space<vmem>>, vector<8x1xf32>
    tpu.vector_store %arg2[%c0_5, %c0_6], %11 {strides = array<i32>} : memref<8x1xf32, #tpu.memory_space<vmem>>, vector<8x1xf32>,
    return
  }
  func.func @transform_0(%arg0: i32) -> (i32, i32) {
    %c0_i32 = arith.constant 0 : i32
    %c0_i32_0 = arith.constant 0 : i32
    return %arg0, %c0_i32 : i32, i32
  }
  func.func @transform_1(%arg0: i32) -> (i32, i32) {
    %c0_i32 = arith.constant 0 : i32
    %c0_i32_0 = arith.constant 0 : i32
    return %arg0, %c0_i32 : i32, i32
  }
}

</mosaic_0001>

<bundles_post_ra>
// kernel: tpu_custom_call.1
= control target key start
LH: loop header
LB: loop body
LE: loop exit
PB: predicated region body
PF: predicated region fallthrough
CT: control target
= control target key end

     0   :  { %6 = vsyncpa [#allocation3], 0  ;;  %s68_s9 = smov [#allocation2]   ;;  %s85_s0 = inlined_call_operand.hbm [shape: f32[8,256], index: 0, kind: input, shape index: {}]   ;;  %s86_s1 = inlined_call_operand.vmem [shape: f32[8,1], index: 1, kind: output, shape index: {}]  }
   0x1   :  { %s12_s8 = sshll.u32 %s85_s0, 4  ;;  %s14_s10 = sshll.u32 %s68_s9, 4  ;;  %s13_s8 = int_to_ptr.hbm [resolvable:$true] %s12_s8  ;;  %s15_s10 = int_to_ptr.vmem [resolvable:$true] %s14_s10 }
   0x2   :  { %17 = dma.hbm_to_vmem [thread:$0]  %s13_s8, 256, %s15_s10, [#allocation3]  }
   0x3   :  { %66 = dma.done.wait [#allocation3], 256  }
   0x4   :  { %67 = vsyncadd [#allocation3], 4294967040  ;;  %v22_v0 = vld [vmem:[#allocation2] sm:$0xff]  ;;  %v23_v1 = vld [vmem:[#allocation2 + $0x8] sm:$0xff]  ;;  %vm34_vm0 = vcmask 7168  }
   0x5   :  { %v24_v2 = vadd.f32 %v23_v1, %v22_v0  ;;  %v27_v3 = vmax.f32 %v22_v0, %v23_v1 }
   0x7   :  { %25 = vadd.xlane.f32.xlu0 %v24_v2 }
   0xf   :  { %28 = vmax.xlane.f32.xlu0 %v27_v3 }
  0x7a   :  { %v26_v4 = vpop.xlane.xlu0 %25 }
  0x7b   :  { %v30_v5 = vmul.f32 0.00390625, %v26_v4 }
  0x7d   :  { %v31_v7 = vmul.f32 0.5, %v30_v5 }
  0x82   :  { %v29_v6 = vpop.xlane.xlu0 %28 }
  0x83   :  { %v32_v8 = vmul.f32 0.5, %v29_v6 }
  0x85   :  { %v33_v9 = vadd.f32 %v32_v8, %v31_v7 }
  0x87   :  { %35 = vst.msk [vmem:[%s86_s1] sm:$0xff] %vm34_vm0, %v33_v9 }
  0x88   :  { %40 = vsyncpa [#allocation3], 1 }

</bundles_post_ra>
